<compile_context>
chip_gen: v6e
topology: v6e:2x2x1
jax: 0.10.0
libtpu: 0.0.40
codegen_flags: <defaults>
</compile_context>

<pallas_src>
import jax
import jax.numpy as jnp
from jax import lax
from jax.experimental import pallas as pl
from jax.experimental.pallas import tpu as pltpu


# --------------------------------------------------------------------------
# Pallas kernels
# --------------------------------------------------------------------------
def _matmul_bias_kernel(x_ref, w_ref, b_ref, o_ref):
    """o = x @ w + b  (one large lane-dense MXU matmul)."""
    o_ref[...] = (
        jnp.dot(x_ref[...], w_ref[...], preferred_element_type=jnp.float32)
        + b_ref[...]
    )


def _dual_matmul_bias_kernel(xa_ref, xb_ref, wa_ref, wb_ref, b_ref, o_ref):
    """o = xa @ wa + xb @ wb + b (fwd/bwd halves consumed without an HBM concat)."""
    o_ref[...] = (
        jnp.dot(xa_ref[...], wa_ref[...], preferred_element_type=jnp.float32)
        + jnp.dot(xb_ref[...], wb_ref[...], preferred_element_type=jnp.float32)
        + b_ref[...]
    )


def _bilstm_recurrence_kernel(xg_ref, whh_f_ref, whh_b_ref, out_f_ref, out_b_ref):
    """Fused forward + backward LSTM recurrence (input projection precomputed).

    xg_ref:    (T, B, 8H)  x @ W_ih + b for both directions
               (cols [0:4H] = forward gates, [4H:8H] = backward gates;
               PyTorch gate order i, f, g, o inside each 4H block)
    whh_*_ref: (H, 4H)     recurrent weights (fwd / bwd)
    out_f_ref: (T, B, H)   forward hidden states
    out_b_ref: (T, B, H)   backward hidden states (already in forward time order)
    """
    T, B, _ = xg_ref.shape
    H = whh_f_ref.shape[0]
    G = 4 * H

    def cell(gates, c):
        i_g = jax.nn.sigmoid(gates[:, 0 * H:1 * H])
        f_g = jax.nn.sigmoid(gates[:, 1 * H:2 * H])
        g_g = jnp.tanh(gates[:, 2 * H:3 * H])
        o_g = jax.nn.sigmoid(gates[:, 3 * H:4 * H])
        c_new = f_g * c + i_g * g_g
        h_new = o_g * jnp.tanh(c_new)
        return h_new, c_new

    def step(t, carry):
        h_f, c_f, h_b, c_b = carry
        tb = T - 1 - t
        # Two independent recurrences: the scheduler interleaves them.
        g_f = xg_ref[t][:, :G] + jnp.dot(
            h_f, whh_f_ref[...], preferred_element_type=jnp.float32)
        g_b = xg_ref[tb][:, G:] + jnp.dot(
            h_b, whh_b_ref[...], preferred_element_type=jnp.float32)
        h_f, c_f = cell(g_f, c_f)
        h_b, c_b = cell(g_b, c_b)
        out_f_ref[t] = h_f
        out_b_ref[tb] = h_b
        return (h_f, c_f, h_b, c_b)

    z = jnp.zeros((B, H), jnp.float32)
    lax.fori_loop(0, T, step, (z, z, z, z), unroll=True)


# --------------------------------------------------------------------------
# pallas_call wrappers
# --------------------------------------------------------------------------
_VMEM_SPEC = pl.BlockSpec(memory_space=pltpu.MemorySpace.VMEM)


def _project(x2d, w, b):
    N = x2d.shape[0]
    G = w.shape[1]
    return pl.pallas_call(
        _matmul_bias_kernel,
        out_shape=jax.ShapeDtypeStruct((N, G), jnp.float32),
        in_specs=[_VMEM_SPEC] * 3,
        out_specs=_VMEM_SPEC,
    )(x2d, w, b)


def _project_dual(xa2d, xb2d, wa, wb, b):
    N = xa2d.shape[0]
    G = wa.shape[1]
    return pl.pallas_call(
        _dual_matmul_bias_kernel,
        out_shape=jax.ShapeDtypeStruct((N, G), jnp.float32),
        in_specs=[_VMEM_SPEC] * 5,
        out_specs=_VMEM_SPEC,
    )(xa2d, xb2d, wa, wb, b)


def _bilstm_layer(xg_tbg, w_hh_f, w_hh_b):
    T, B, _ = xg_tbg.shape
    H = w_hh_f.shape[0]
    return pl.pallas_call(
        _bilstm_recurrence_kernel,
        out_shape=(jax.ShapeDtypeStruct((T, B, H), jnp.float32),
                   jax.ShapeDtypeStruct((T, B, H), jnp.float32)),
        in_specs=[_VMEM_SPEC] * 3,
        out_specs=(_VMEM_SPEC, _VMEM_SPEC),
    )(xg_tbg, w_hh_f, w_hh_b)


def lstm_model_forward(params, x):
    """Matches LSTMModel.forward: 2-layer bidirectional LSTM -> Linear.

    x: (B, T, input_size) batch-first.  Returns (B, T, output_size).
    """
    H = params["hidden_size"]
    O = params["output_size"]
    B, T, D = x.shape

    # One transpose to time-major up front; everything stays time-major after.
    x_flat = jnp.swapaxes(x, 0, 1).reshape(T * B, D)

    out_f = out_b = None
    for layer in range(2):
        p = params["lstm"][layer]
        if layer == 0:
            xg = _project(x_flat, p["w_ih_both"], p["b_both"])
        else:
            # Previous layer's (fwd | bwd) concat folded into two matmuls.
            xg = _project_dual(
                out_f.reshape(T * B, H), out_b.reshape(T * B, H),
                p["w_ih_both"][:H], p["w_ih_both"][H:], p["b_both"])
        out_f, out_b = _bilstm_layer(
            xg.reshape(T, B, 8 * H), p["w_hh_f"], p["w_hh_b"])

    # Linear head: fwd/bwd halves consumed directly; output padded to 128
    # lanes for an unmasked store, sliced back afterwards.
    fc_w_pad = params["fc_w_pad"]
    O_pad = fc_w_pad.shape[1]
    y = _project_dual(out_f.reshape(T * B, H), out_b.reshape(T * B, H),
                      fc_w_pad[:H], fc_w_pad[H:], params["fc_b_pad"])
    y = y.reshape(T, B, O_pad)[:, :, :O]
    return jnp.swapaxes(y, 0, 1)  # (B, T, O)


# --------------------------------------------------------------------------
# Deterministic parameter init (PyTorch-style uniform(-1/sqrt(H), 1/sqrt(H)))
# --------------------------------------------------------------------------
def init_params(key, input_size, hidden_size, output_size):
    H = hidden_size
    O = output_size
    O_pad = ((O + 127) // 128) * 128
    bound = 1.0 / jnp.sqrt(jnp.float32(H))
    keys = iter(jax.random.split(key, 32))

    def u(shape):
        return jax.random.uniform(next(keys), shape, jnp.float32, -bound, bound)

    lstm = []
    in_sz = input_size
    for _layer in range(2):
        p = {}
        for d in ("f", "b"):  # forward / reverse directions
            p[f"w_ih_{d}"] = u((in_sz, 4 * H))
            p[f"w_hh_{d}"] = u((H, 4 * H))
            p[f"b_{d}"] = (u((4 * H,)) + u((4 * H,))).reshape(1, 4 * H)
        # Fused forms used by the kernels.
        p["w_ih_both"] = jnp.concatenate([p["w_ih_f"], p["w_ih_b"]], axis=1)
        p["b_both"] = jnp.concatenate([p["b_f"], p["b_b"]], axis=1)
        lstm.append(p)
        in_sz = 2 * H

    fc_w = u((2 * H, O))
    fc_b = u((O,)).reshape(1, O)
    fc_w_pad = jnp.zeros((2 * H, O_pad), jnp.float32).at[:, :O].set(fc_w)
    fc_b_pad = jnp.zeros((1, O_pad), jnp.float32).at[:, :O].set(fc_b)
    return {
        "hidden_size": H, "output_size": O, "lstm": lstm,
        "fc_w": fc_w, "fc_b": fc_b,
        "fc_w_pad": fc_w_pad, "fc_b_pad": fc_b_pad,
    }


# --------------------------------------------------------------------------
# Pure-JAX reference (semantic check against unfused per-direction params)
# --------------------------------------------------------------------------
def _ref_lstm_dir(x, w_ih, w_hh, b, H):
    B, T, D = x.shape

    def step(carry, x_t):
        h, c = carry
        gates = x_t @ w_ih + h @ w_hh + b[0]
        i_g = jax.nn.sigmoid(gates[:, :H])
        f_g = jax.nn.sigmoid(gates[:, H:2 * H])
        g_g = jnp.tanh(gates[:, 2 * H:3 * H])
        o_g = jax.nn.sigmoid(gates[:, 3 * H:])
        c = f_g * c + i_g * g_g
        h = o_g * jnp.tanh(c)
        return (h, c), h

    init = (jnp.zeros((B, H), jnp.float32), jnp.zeros((B, H), jnp.float32))
    _, hs = lax.scan(step, init, jnp.swapaxes(x, 0, 1))
    return jnp.swapaxes(hs, 0, 1)


def reference_forward(params, x):
    H = params["hidden_size"]
    layer_in = x
    for layer in range(2):
        p = params["lstm"][layer]
        fwd = _ref_lstm_dir(layer_in, p["w_ih_f"], p["w_hh_f"], p["b_f"], H)
        bwd = _ref_lstm_dir(
            layer_in[:, ::-1, :], p["w_ih_b"], p["w_hh_b"], p["b_b"], H
        )[:, ::-1, :]
        layer_in = jnp.concatenate([fwd, bwd], axis=-1)
    return layer_in @ params["fc_w"] + params["fc_b"][0]


# --------------------------------------------------------------------------
if __name__ == "__main__":
    B, T = 2, 8
    input_size, hidden_size, output_size = 16, 128, 58  # module: H=128, O=58

    key = jax.random.PRNGKey(0)
    pkey, xkey = jax.random.split(key)
    params = init_params(pkey, input_size, hidden_size, output_size)
    x = jax.random.normal(xkey, (B, T, input_size), jnp.float32)

    out = jax.block_until_ready(lstm_model_forward(params, x))
    assert out.shape == (B, T, output_size), out.shape

    ref = jax.block_until_ready(reference_forward(params, x))
    max_err = float(jnp.max(jnp.abs(out - ref)))
    assert jnp.allclose(out, ref, atol=2e-3, rtol=2e-3), max_err

    print("KERNEL_OK")
</pallas_src>

<mosaic_0001>
module attributes {stable_mosaic.version = 11 : i64} {
  func.func @_matmul_bias_kernel(%arg0: memref<16x16xf32, #tpu.memory_space<vmem>>, %arg1: memref<16x1024xf32, #tpu.memory_space<vmem>>, %arg2: memref<1x1024xf32, #tpu.memory_space<vmem>>, %arg3: memref<16x1024xf32, #tpu.memory_space<vmem>>) attributes {dimension_semantics = [], scalar_prefetch = 0 : i64, scratch_operands = 0 : i64, tpu.core_type = #tpu.core_type<tc>} {
    %c0 = arith.constant 0 : index
    %c0_0 = arith.constant 0 : index
    %0 = vector.load %arg0[%c0, %c0_0] : memref<16x16xf32, #tpu.memory_space<vmem>>, vector<16x16xf32>
    %c0_1 = arith.constant 0 : index
    %c0_2 = arith.constant 0 : index
    %1 = vector.load %arg1[%c0_1, %c0_2] : memref<16x1024xf32, #tpu.memory_space<vmem>>, vector<16x1024xf32>
    %cst = arith.constant dense<0.000000e+00> : vector<16x1024xf32>
    %2 = tpu.matmul %0, %1, %cst {dimension_numbers = #tpu.dot_dimension_numbers<[1], [0], [0], [1], [0, 0, 1, 1], [], []>} : vector<16x16xf32>, vector<16x1024xf32>, vector<16x1024xf32> -> vector<16x1024xf32>
    %c0_3 = arith.constant 0 : index
    %c0_4 = arith.constant 0 : index
    %3 = vector.load %arg2[%c0_3, %c0_4] : memref<1x1024xf32, #tpu.memory_space<vmem>>, vector<1x1024xf32>
    %4 = vector.broadcast %3 : vector<1x1024xf32> to vector<16x1024xf32>
    %5 = arith.addf %2, %4 : vector<16x1024xf32>
    %c0_5 = arith.constant 0 : index
    %c0_6 = arith.constant 0 : index
    %6 = vector.load %arg3[%c0_5, %c0_6] : memref<16x1024xf32, #tpu.memory_space<vmem>>, vector<16x1024xf32>
    tpu.vector_store %arg3[%c0_5, %c0_6], %5 {strides = array<i32>} : memref<16x1024xf32, #tpu.memory_space<vmem>>, vector<16x1024xf32>,
    return
  }
}

</mosaic_0001>

<bundles_post_ra>
// kernel: tpu_custom_call.1
= control target key start
LH: loop header
LB: loop body
LE: loop exit
PB: predicated region body
PF: predicated region fallthrough
CT: control target
= control target key end

     0   :  { %8 = vsyncpa [#allocation3], 0  ;;  %s621_s0 = inlined_call_operand.hbm [shape: f32[16,16], index: 0, kind: input, shape index: {}]   ;;  %s622_s1 = inlined_call_operand.hbm [shape: f32[16,1024], index: 1, kind: input, shape index: {}]   ;;  %s623_s2 = inlined_call_operand.hbm [shape: f32[1,1024], index: 2, kind: input, shape index: {}]   ;;  %s624_s3 = inlined_call_operand.hbm [shape: f32[16,1024], index: 3, kind: output, shape index: {}]  }
   0x1   :  { %9 = vsyncpa [#allocation6], 0 }
   0x2   :  { %10 = vsyncpa [#allocation4], 0  ;;  %s566_s12 = smov [#allocation5]  }
   0x3   :  { %s28_s13 = sshll.u32 %s566_s12, 4  ;;  %s29_s13 = int_to_ptr.vmem [resolvable:$true] %s28_s13 }
   0x4   :  { %s488_s14 = scalar_lea.vmem %s29_s13, 2048  ;;  %p493_p1 = scmp.lt.s32.totalorder %s29_s13, %s29_s13 }
   0x5   :  { %p489_p0 = scmp.ne.s32.totalorder %s29_s13, %s488_s14  ;;  %p494_p2 = scmp.lt.s32.totalorder %s488_s14, %s488_s14 }
   0x7   :  { %p495_p3 = por %p494_p2, %p493_p1 }
   0x9   :  { %p496_p4 = pnand %p495_p3, %p489_p0 }
   0xb   :  { %499 = shalt.err (!%p496_p4)
}
   0xc   :  { %s567_s15 = smov 1024   ;;  %s568_s16 = smov 64  }
   0xd   :  { %34 = dma.hbm_to_vmem [thread:$0]  %s622_s1, 2048, %s29_s13, [#allocation6], %s567_s15, %s567_s15, %s568_s16  }
   0xe   :  { %s569_s19 = smov [#allocation2]  }
   0xf   :  { %s16_s20 = sshll.u32 %s569_s19, 4  ;;  %s17_s20 = int_to_ptr.vmem [resolvable:$true] %s16_s20 }
  0x10   :  { %s508_s21 = scalar_lea.vmem %s17_s20, 256  ;;  %p513_p6 = scmp.lt.s32.totalorder %s17_s20, %s17_s20 }
  0x11   :  { %p509_p5 = scmp.ne.s32.totalorder %s17_s20, %s508_s21  ;;  %p514_p7 = scmp.lt.s32.totalorder %s508_s21, %s508_s21 }
  0x13   :  { %p515_p8 = por %p514_p7, %p513_p6 }
  0x15   :  { %p516_p9 = pnand %p515_p8, %p509_p5 }
  0x17   :  { %519 = shalt.err (!%p516_p9)
}
  0x18   :  { %s570_s22 = smov 128   ;;  %s571_s23 = smov 8  }
  0x19   :  { %22 = dma.hbm_to_vmem [thread:$0]  %s621_s0, 256, %s17_s20, [#allocation3], %s570_s22, %s570_s22, %s571_s23  }
  0x1a   :  { %s572_s26 = smov [#allocation7]  }
  0x1b   :  { %s41_s27 = sshll.u32 %s572_s26, 4  ;;  %s42_s27 = int_to_ptr.vmem [resolvable:$true] %s41_s27 }
  0x1c   :  { %s528_s1 = scalar_lea.vmem %s42_s27, 128  ;;  %p533_p11 = scmp.lt.s32.totalorder %s42_s27, %s42_s27 }
  0x1d   :  { %p529_p10 = scmp.ne.s32.totalorder %s42_s27, %s528_s1  ;;  %p534_p12 = scmp.lt.s32.totalorder %s528_s1, %s528_s1 }
  0x1f   :  { %p535_p13 = por %p534_p12, %p533_p11 }
  0x21   :  { %p536_p0 = pnand %p535_p13, %p529_p10 }
  0x23   :  { %539 = shalt.err (!%p536_p0)
}
  0x24   :  { %44 = dma.hbm_to_vmem [thread:$0]  %s623_s2, 128, %s42_s27, [#allocation6]  }
  0x25   :  { %560 = dma.done.wait [#allocation3], 256  }
  0x26   :  { %561 = vsyncadd [#allocation3], 4294967040 }
  0x27   :  { %562 = dma.done.wait [#allocation6], 2176  }
  0x28   :  { %563 = vsyncadd [#allocation6], 4294965120  ;;  %v573_v0 = vmov 0.0   ;;  %v65_v1 = vld [vmem:[#allocation5 + $0x48] sm:$0xff]  ;;  %v67_v2 = vld [vmem:[#allocation5 + $0x58] sm:$0xff]  ;;  %vm114_vm0 = vcmask 130048   ;;  %v74_v19 = vlaneseq }
  0x29   :  { %185 = vmatprep.mubr.f32.mxu0 %v573_v0  ;;  %262 = vmatprep.mubr.f32.mxu1 %v573_v0  ;;  %v64_v3 = vld [vmem:[#allocation5 + $0x40] sm:$0xff]  ;;  %v66_v4 = vld [vmem:[#allocation5 + $0x50] sm:$0xff]  ;;  %v57_v5 = vld [vmem:[#allocation5 + $0x8] sm:$0xff]  ;;  %s574_s0 = smov [#allocation8]  }
  0x2a   :  { %149 = vmatprep.subr.mxu0 %v65_v1  ;;  %226 = vmatprep.subr.mxu1 %v67_v2  ;;  %v59_v6 = vld [vmem:[#allocation5 + $0x18] sm:$0xff]  ;;  %v56_v7 = vld [vmem:[#allocation5] sm:$0xff]  ;;  %v58_v8 = vld [vmem:[#allocation5 + $0x10] sm:$0xff]  ;;  %v75_v20 = vshrl.u32 %v74_v19, 7  ;;  %s450_s2 = sshll.u32 %s574_s0, 4  ;;  %s451_s2 = int_to_ptr.vmem [resolvable:$true] %s450_s2 }
  0x2b   :  { %150 = vmatpush1.msra.mxu0 %v64_v3  ;;  %227 = vmatpush1.msra.mxu1 %v66_v4  ;;  %v54_v9 = vld [vmem:[#allocation2] sm:$0xff]  ;;  %v69_v10 = vld [vmem:[#allocation5 + $0x68] sm:$0xff]  ;;  %v71_v11 = vld [vmem:[#allocation5 + $0x78] sm:$0xff]  ;;  %s540_s30 = scalar_lea.vmem %s451_s2, 2048  ;;  %p545_p2 = scmp.lt.s32.totalorder %s451_s2, %s451_s2 }
  0x2c   :  { %151 = vmatprep.subr.mxu0 %v57_v5  ;;  %228 = vmatprep.subr.mxu1 %v59_v6  ;;  %v68_v12 = vld [vmem:[#allocation5 + $0x60] sm:$0xff]  ;;  %v70_v13 = vld [vmem:[#allocation5 + $0x70] sm:$0xff]  ;;  %v55_v14 = vld [vmem:[#allocation2 + $0x8] sm:$0xff]  ;;  %v76_v21 = vsub.s32 0, %v75_v20  ;;  %v84_v22 = vsub.s32 2, %v75_v20  ;;  %v80_v24 = vsub.s32 1, %v75_v20  ;;  %p541_p1 = scmp.ne.s32.totalorder %s451_s2, %s540_s30  ;;  %p546_p3 = scmp.lt.s32.totalorder %s540_s30, %s540_s30 }
  0x2d   :  { %152 = vmatpush1.msra.mxu0 %v56_v7  ;;  %229 = vmatpush1.msra.mxu1 %v58_v8  ;;  %v61_v15 = vld [vmem:[#allocation5 + $0x28] sm:$0xff]  ;;  %v63_v16 = vld [vmem:[#allocation5 + $0x38] sm:$0xff]  ;;  %v60_v17 = vld [vmem:[#allocation5 + $0x20] sm:$0xff]  ;;  %v88_v25 = vsub.s32 3, %v75_v20  ;;  %v92_v34 = vsub.s32 4, %v75_v20  ;;  %v100_v35 = vsub.s32 6, %v75_v20 }
  0x2e   :  { %463 = vmatmul.mubr.msk.f32.vlgmr.msra.gmra.mxu0 %vm114_vm0, %v54_v9  ;;  %465 = vmatmul.mubr.msk.f32.vlgmr.msra.gmra.mxu1 %vm114_vm0, %v54_v9  ;;  %v62_v18 = vld [vmem:[#allocation5 + $0x30] sm:$0xff]  ;;  %v72_v23 = vld [vmem:[#allocation7] sm:$0xff]  ;;  %v96_v40 = vsub.s32 5, %v75_v20  ;;  %v104_v41 = vsub.s32 7, %v75_v20  ;;  %p547_p4 = por %p546_p3, %p545_p2 }
  0x2f   :  { %303 = vmatprep.subr.mxu0 %v69_v10  ;;  %380 = vmatprep.subr.mxu1 %v71_v11  ;;  %v77_v26 = vrot.slane %v72_v23, %v76_v21  ;;  %v85_v27 = vrot.slane %v72_v23, %v84_v22  ;;  %v81_v28 = vrot.slane %v72_v23, %v80_v24 }
  0x30   :  { %304 = vmatpush1.msra.mxu0 %v68_v12  ;;  %381 = vmatpush1.msra.mxu1 %v70_v13  ;;  %v89_v29 = vrot.slane %v72_v23, %v88_v25  ;;  %v93_v46 = vrot.slane %v72_v23, %v92_v34  ;;  %v101_v47 = vrot.slane %v72_v23, %v100_v35  ;;  %p548_p5 = pnand %p547_p4, %p541_p1 }
  0x31   :  { %191 = vmatprep.mubr.f32.mxu0 %v573_v0  ;;  %268 = vmatprep.mubr.f32.mxu1 %v573_v0  ;;  %v97_v52 = vrot.slane %v72_v23, %v96_v40  ;;  %v105_v53 = vrot.slane %v72_v23, %v104_v41 }
  0x32   :  { %464 = vmatmul.mubr.msk.f32.gmra.mxu0 %vm114_vm0, %v55_v14  ;;  %466 = vmatmul.mubr.msk.f32.gmra.mxu1 %vm114_vm0, %v55_v14 }
  0x33   :  { %305 = vmatprep.subr.mxu0 %v61_v15  ;;  %382 = vmatprep.subr.mxu1 %v63_v16 }
  0x34   :  { %306 = vmatpush1.msra.mxu0 %v60_v17  ;;  %383 = vmatpush1.msra.mxu1 %v62_v18 }
  0x35   :  { %339 = vmatprep.mubr.f32.mxu0 %v573_v0  ;;  %416 = vmatprep.mubr.f32.mxu1 %v573_v0 }
  0x36   :  { %467 = vmatmul.mubr.msk.f32.vlgmr.msra.gmra.mxu0 %vm114_vm0, %v54_v9  ;;  %469 = vmatmul.mubr.msk.f32.vlgmr.msra.gmra.mxu1 %vm114_vm0, %v54_v9 }
  0x37   :  { %345 = vmatprep.mubr.f32.mxu0 %v573_v0  ;;  %422 = vmatprep.mubr.f32.mxu1 %v573_v0 }
  0x3a   :  { %468 = vmatmul.mubr.msk.f32.gmra.mxu0 %vm114_vm0, %v55_v14  ;;  %470 = vmatmul.mubr.msk.f32.gmra.mxu1 %vm114_vm0, %v55_v14 }
  0xee   :  { %v187_v30 = vpop.f32.mrf.mxu0  ;;  %v264_v31 = vpop.f32.mrf.mxu1 }
  0xef   :  { %v188_v32 = vadd.f32 %v187_v30, %v77_v26  ;;  %v265_v33 = vadd.f32 %v264_v31, %v85_v27 }
  0xf0   :  { %v189_v36 = vpop.f32.mrf.mxu0  ;;  %v266_v37 = vpop.f32.mrf.mxu1 }
  0xf1   :  { %429 = vst [vmem:[#allocation8] sm:$0xff] %v188_v32  ;;  %431 = vst [vmem:[#allocation8 + $0x10] sm:$0xff] %v265_v33  ;;  %v190_v38 = vadd.f32 %v189_v36, %v81_v28  ;;  %v267_v39 = vadd.f32 %v266_v37, %v89_v29 }
  0xf2   :  { %v193_v42 = vpop.f32.mrf.mxu0  ;;  %v270_v43 = vpop.f32.mrf.mxu1 }
  0xf3   :  { %430 = vst [vmem:[#allocation8 + $0x8] sm:$0xff] %v190_v38  ;;  %432 = vst [vmem:[#allocation8 + $0x18] sm:$0xff] %v267_v39  ;;  %v194_v44 = vadd.f32 %v193_v42, %v77_v26  ;;  %v271_v45 = vadd.f32 %v270_v43, %v85_v27 }
  0xf4   :  { %v195_v48 = vpop.f32.mrf.mxu0  ;;  %v272_v49 = vpop.f32.mrf.mxu1 }
  0xf5   :  { %437 = vst [vmem:[#allocation8 + $0x40] sm:$0xff] %v194_v44  ;;  %439 = vst [vmem:[#allocation8 + $0x50] sm:$0xff] %v271_v45  ;;  %v196_v50 = vadd.f32 %v195_v48, %v81_v28  ;;  %v273_v51 = vadd.f32 %v272_v49, %v89_v29 }
  0xf6   :  { %v341_v54 = vpop.f32.mrf.mxu0  ;;  %v418_v55 = vpop.f32.mrf.mxu1 }
  0xf7   :  { %438 = vst [vmem:[#allocation8 + $0x48] sm:$0xff] %v196_v50  ;;  %440 = vst [vmem:[#allocation8 + $0x58] sm:$0xff] %v273_v51  ;;  %v342_v56 = vadd.f32 %v341_v54, %v93_v46  ;;  %v419_v57 = vadd.f32 %v418_v55, %v101_v47 }
  0xf8   :  { %v343_v58 = vpop.f32.mrf.mxu0  ;;  %v420_v59 = vpop.f32.mrf.mxu1 }
  0xf9   :  { %433 = vst [vmem:[#allocation8 + $0x20] sm:$0xff] %v342_v56  ;;  %435 = vst [vmem:[#allocation8 + $0x30] sm:$0xff] %v419_v57  ;;  %v344_v60 = vadd.f32 %v343_v58, %v97_v52  ;;  %v421_v61 = vadd.f32 %v420_v59, %v105_v53 }
  0xfa   :  { %v347_v62 = vpop.f32.mrf.mxu0  ;;  %v424_v63 = vpop.f32.mrf.mxu1 }
  0xfb   :  { %434 = vst [vmem:[#allocation8 + $0x28] sm:$0xff] %v344_v60  ;;  %436 = vst [vmem:[#allocation8 + $0x38] sm:$0xff] %v421_v61  ;;  %v348_v0 = vadd.f32 %v347_v62, %v93_v46  ;;  %v425_v1 = vadd.f32 %v424_v63, %v101_v47 }
  0xfc   :  { %v349_v2 = vpop.f32.mrf.mxu0  ;;  %v426_v3 = vpop.f32.mrf.mxu1 }
  0xfd   :  { %441 = vst [vmem:[#allocation8 + $0x60] sm:$0xff] %v348_v0  ;;  %443 = vst [vmem:[#allocation8 + $0x70] sm:$0xff] %v425_v1  ;;  %v350_v4 = vadd.f32 %v349_v2, %v97_v52  ;;  %v427_v5 = vadd.f32 %v426_v3, %v105_v53 }
  0xff   :  { %442 = vst [vmem:[#allocation8 + $0x68] sm:$0xff] %v350_v4  ;;  %444 = vst [vmem:[#allocation8 + $0x78] sm:$0xff] %v427_v5 }
 0x100   :  { %551 = shalt.err (!%p548_p5)
}
 0x101   :  { %456 = dma.vmem_to_hbm [thread:$0]  %s451_s2, 2048, %s624_s3, [#allocation4], %s567_s15, %s567_s15, %s568_s16  }
 0x102   :  { %564 = dma.done.wait [#allocation4], 2048  }
 0x103   :  { %565 = vsyncadd [#allocation4], 4294965248 }
 0x104   :  { %460 = vsyncpa [#allocation3], 1 }
 0x105   :  { %461 = vsyncpa [#allocation6], 1 }
 0x106   :  { %462 = vsyncpa [#allocation4], 1 }

</bundles_post_ra>
